<compile_context>
chip_gen: v7x
topology: tpu7x:2x2x1
jax: 0.10.0
libtpu: 0.0.40
codegen_flags: <defaults>
</compile_context>

<pallas_src>
import jax
import jax.numpy as jnp
from jax import lax
from jax.experimental import pallas as pl
from jax.experimental.pallas import tpu as pltpu

# Small, module-consistent shapes.
N, CIN, COUT = 2, 4, 8
H, W = 16, 16
KH, KW = 3, 3

WP = W + 2              # zero-padded width  = 18
HP = H + KH             # zero-padded height = 19 (1 top + H + 2 bottom; the extra
                        # bottom row keeps every tap-offset slice in range and is zero)
PAD_FLAT = HP * WP      # 342 flattened padded pixels per image
OUT_WIDE = H * WP       # 288 "wide" output positions per image (16 rows x 18 cols;
                        # cols 16,17 of each row are junk, dropped in the wrapper)
NTAP = KH * KW          # 9


def conv3x3_relu_kernel(w_ref, x_ref, o_ref):
    """Fused 3x3 'same' conv + bias + ReLU, im2col done in-kernel.

    w_ref : (NTAP+1, COUT, CIN) = (10, 8, 4)  tap weights; slab 9 col 0 = bias
    x_ref : (N, CIN, PAD_FLAT)  = (2, 4, 342) flattened zero-padded NCHW input
    o_ref : (N, COUT, OUT_WIDE) = (2, 8, 288) wide output (row-major h*WP + w)
    """
    bias = w_ref[NTAP][:, 0:1]                          # (COUT, 1)
    for n in range(N):                                  # static unroll, N = 2
        x_n = x_ref[n]                                  # (CIN, PAD_FLAT) one load
        acc = jnp.zeros((COUT, OUT_WIDE), jnp.float32)
        for kh in range(KH):
            for kw in range(KW):
                t = kh * KW + kw
                off = kh * WP + kw                      # static lane offset of this tap
                acc += jnp.dot(w_ref[t],                # (COUT, CIN)
                               x_n[:, off:off + OUT_WIDE],   # (CIN, OUT_WIDE)
                               preferred_element_type=jnp.float32)
        o_ref[n] = jnp.maximum(acc + bias, 0.0)         # bias + ReLU, lane-dense store


def conv2d_relu(x_nchw, w_oihw, bias):
    """Wrapper: NCHW in / NCHW out, conv3x3 stride 1 'same' padding + ReLU."""
    # ---- weight packing (≈1.4 KiB, one-time prepack in real use) ----
    w_taps = jnp.transpose(w_oihw, (2, 3, 0, 1)).reshape(NTAP, COUT, CIN)   # (9, 8, 4)
    b_slab = jnp.zeros((1, COUT, CIN), jnp.float32).at[0, :, 0].set(bias)   # bias slab
    w_all = jnp.concatenate([w_taps, b_slab], axis=0)                        # (10, 8, 4)

    # ---- input prep: one pad + one (bitcast) reshape, ~11 KiB total ----
    x_pad = jnp.pad(x_nchw, ((0, 0), (0, 0), (1, KH - 1), (1, 1)))  # (N, CIN, 19, 18)
    x_flat = x_pad.reshape(N, CIN, PAD_FLAT)                         # (N, CIN, 342)

    cost = pl.CostEstimate(
        flops=2 * N * OUT_WIDE * COUT * (NTAP * CIN),
        transcendentals=0,
        bytes_accessed=4 * ((NTAP + 1) * COUT * CIN
                            + N * CIN * PAD_FLAT
                            + N * COUT * OUT_WIDE),
    )

    out_wide = pl.pallas_call(
        conv3x3_relu_kernel,
        out_shape=jax.ShapeDtypeStruct((N, COUT, OUT_WIDE), jnp.float32),
        in_specs=[
            pl.BlockSpec(memory_space=pltpu.MemorySpace.VMEM),  # packed weights+bias
            pl.BlockSpec(memory_space=pltpu.MemorySpace.VMEM),  # flattened padded input
        ],
        out_specs=pl.BlockSpec(memory_space=pltpu.MemorySpace.VMEM),
        cost_estimate=cost,
    )(w_all, x_flat)                                             # (N, COUT, 288)

    # (N, COUT, H*WP) -> (N, COUT, H, WP) is a layout-compatible (free) reshape;
    # the single strided slice drops the two pad columns per row -> NCHW output.
    return out_wide.reshape(N, COUT, H, WP)[:, :, :, :W]


def kaiming_normal_fan_out_relu(key, shape):
    """nn.init.kaiming_normal_(w, mode='fan_out', nonlinearity='relu') for OIHW."""
    cout, _, kh, kw = shape
    fan_out = cout * kh * kw
    gain = jnp.sqrt(2.0)                               # ReLU gain
    std = gain / jnp.sqrt(float(fan_out))
    return jax.random.normal(key, shape, dtype=jnp.float32) * std


if __name__ == "__main__":
    key = jax.random.PRNGKey(0)
    kx, kw_key = jax.random.split(key)

    x = jax.random.normal(kx, (N, CIN, H, W), dtype=jnp.float32)   # NCHW input
    w = kaiming_normal_fan_out_relu(kw_key, (COUT, CIN, KH, KW))   # OIHW weight
    b = jnp.zeros((COUT,), dtype=jnp.float32)                      # zero bias (kaiming_init)

    out = jax.jit(conv2d_relu)(x, w, b)
    out = jax.block_until_ready(out)

    # Cross-check against plain-JAX conv (same semantics as nn.Conv2d + ReLU).
    ref = lax.conv_general_dilated(
        x, w, window_strides=(1, 1), padding="SAME",
        dimension_numbers=("NCHW", "OIHW", "NCHW"))
    ref = jnp.maximum(ref + b.reshape(1, COUT, 1, 1), 0.0)

    assert out.shape == (N, COUT, H, W)
    assert jnp.allclose(out, ref, atol=1e-4, rtol=1e-4)
    print("KERNEL_OK")
</pallas_src>

<mosaic_0001>
module attributes {stable_mosaic.version = 11 : i64} {
  func.func @conv3x3_relu_kernel(%arg0: memref<10x8x4xf32, #tpu.memory_space<vmem>>, %arg1: memref<2x4x342xf32, #tpu.memory_space<vmem>>, %arg2: memref<2x8x288xf32, #tpu.memory_space<vmem>>) attributes {dimension_semantics = [], scalar_prefetch = 0 : i64, scratch_operands = 0 : i64, tpu.core_type = #tpu.core_type<tc>} {
    %c9 = arith.constant 9 : index
    %c0 = arith.constant 0 : index
    %c0_0 = arith.constant 0 : index
    %0 = vector.load %arg0[%c9, %c0, %c0_0] : memref<10x8x4xf32, #tpu.memory_space<vmem>>, vector<1x8x4xf32>
    %1 = vector.shape_cast %0 : vector<1x8x4xf32> to vector<8x4xf32>
    %2 = vector.extract_strided_slice %1 {offsets = [0, 0], sizes = [8, 1], strides = [1, 1]} : vector<8x4xf32> to vector<8x1xf32>
    %c0_1 = arith.constant 0 : index
    %c0_2 = arith.constant 0 : index
    %c0_3 = arith.constant 0 : index
    %3 = vector.load %arg1[%c0_1, %c0_2, %c0_3] : memref<2x4x342xf32, #tpu.memory_space<vmem>>, vector<1x4x342xf32>
    %4 = vector.shape_cast %3 : vector<1x4x342xf32> to vector<4x342xf32>
    %cst = arith.constant 0.000000e+00 : f32
    %5 = vector.broadcast %cst : f32 to vector<8x288xf32>
    %c0_4 = arith.constant 0 : index
    %c0_5 = arith.constant 0 : index
    %c0_6 = arith.constant 0 : index
    %6 = vector.load %arg0[%c0_4, %c0_5, %c0_6] : memref<10x8x4xf32, #tpu.memory_space<vmem>>, vector<1x8x4xf32>
    %7 = vector.shape_cast %6 : vector<1x8x4xf32> to vector<8x4xf32>
    %8 = vector.extract_strided_slice %4 {offsets = [0, 0], sizes = [4, 288], strides = [1, 1]} : vector<4x342xf32> to vector<4x288xf32>
    %cst_7 = arith.constant dense<0.000000e+00> : vector<8x288xf32>
    %9 = tpu.matmul %7, %8, %cst_7 {dimension_numbers = #tpu.dot_dimension_numbers<[1], [0], [0], [1], [0, 0, 1, 1], [], []>} : vector<8x4xf32>, vector<4x288xf32>, vector<8x288xf32> -> vector<8x288xf32>
    %10 = arith.addf %5, %9 : vector<8x288xf32>
    %c1 = arith.constant 1 : index
    %c0_8 = arith.constant 0 : index
    %c0_9 = arith.constant 0 : index
    %11 = vector.load %arg0[%c1, %c0_8, %c0_9] : memref<10x8x4xf32, #tpu.memory_space<vmem>>, vector<1x8x4xf32>
    %12 = vector.shape_cast %11 : vector<1x8x4xf32> to vector<8x4xf32>
    %13 = vector.extract_strided_slice %4 {offsets = [0, 1], sizes = [4, 288], strides = [1, 1]} : vector<4x342xf32> to vector<4x288xf32>
    %cst_10 = arith.constant dense<0.000000e+00> : vector<8x288xf32>
    %14 = tpu.matmul %12, %13, %cst_10 {dimension_numbers = #tpu.dot_dimension_numbers<[1], [0], [0], [1], [0, 0, 1, 1], [], []>} : vector<8x4xf32>, vector<4x288xf32>, vector<8x288xf32> -> vector<8x288xf32>
    %15 = arith.addf %10, %14 : vector<8x288xf32>
    %c2 = arith.constant 2 : index
    %c0_11 = arith.constant 0 : index
    %c0_12 = arith.constant 0 : index
    %16 = vector.load %arg0[%c2, %c0_11, %c0_12] : memref<10x8x4xf32, #tpu.memory_space<vmem>>, vector<1x8x4xf32>
    %17 = vector.shape_cast %16 : vector<1x8x4xf32> to vector<8x4xf32>
    %18 = vector.extract_strided_slice %4 {offsets = [0, 2], sizes = [4, 288], strides = [1, 1]} : vector<4x342xf32> to vector<4x288xf32>
    %cst_13 = arith.constant dense<0.000000e+00> : vector<8x288xf32>
    %19 = tpu.matmul %17, %18, %cst_13 {dimension_numbers = #tpu.dot_dimension_numbers<[1], [0], [0], [1], [0, 0, 1, 1], [], []>} : vector<8x4xf32>, vector<4x288xf32>, vector<8x288xf32> -> vector<8x288xf32>
    %20 = arith.addf %15, %19 : vector<8x288xf32>
    %c3 = arith.constant 3 : index
    %c0_14 = arith.constant 0 : index
    %c0_15 = arith.constant 0 : index
    %21 = vector.load %arg0[%c3, %c0_14, %c0_15] : memref<10x8x4xf32, #tpu.memory_space<vmem>>, vector<1x8x4xf32>
    %22 = vector.shape_cast %21 : vector<1x8x4xf32> to vector<8x4xf32>
    %23 = vector.extract_strided_slice %4 {offsets = [0, 18], sizes = [4, 288], strides = [1, 1]} : vector<4x342xf32> to vector<4x288xf32>
    %cst_16 = arith.constant dense<0.000000e+00> : vector<8x288xf32>
    %24 = tpu.matmul %22, %23, %cst_16 {dimension_numbers = #tpu.dot_dimension_numbers<[1], [0], [0], [1], [0, 0, 1, 1], [], []>} : vector<8x4xf32>, vector<4x288xf32>, vector<8x288xf32> -> vector<8x288xf32>
    %25 = arith.addf %20, %24 : vector<8x288xf32>
    %c4 = arith.constant 4 : index
    %c0_17 = arith.constant 0 : index
    %c0_18 = arith.constant 0 : index
    %26 = vector.load %arg0[%c4, %c0_17, %c0_18] : memref<10x8x4xf32, #tpu.memory_space<vmem>>, vector<1x8x4xf32>
    %27 = vector.shape_cast %26 : vector<1x8x4xf32> to vector<8x4xf32>
    %28 = vector.extract_strided_slice %4 {offsets = [0, 19], sizes = [4, 288], strides = [1, 1]} : vector<4x342xf32> to vector<4x288xf32>
    %cst_19 = arith.constant dense<0.000000e+00> : vector<8x288xf32>
    %29 = tpu.matmul %27, %28, %cst_19 {dimension_numbers = #tpu.dot_dimension_numbers<[1], [0], [0], [1], [0, 0, 1, 1], [], []>} : vector<8x4xf32>, vector<4x288xf32>, vector<8x288xf32> -> vector<8x288xf32>
    %30 = arith.addf %25, %29 : vector<8x288xf32>
    %c5 = arith.constant 5 : index
    %c0_20 = arith.constant 0 : index
    %c0_21 = arith.constant 0 : index
    %31 = vector.load %arg0[%c5, %c0_20, %c0_21] : memref<10x8x4xf32, #tpu.memory_space<vmem>>, vector<1x8x4xf32>
    %32 = vector.shape_cast %31 : vector<1x8x4xf32> to vector<8x4xf32>
    %33 = vector.extract_strided_slice %4 {offsets = [0, 20], sizes = [4, 288], strides = [1, 1]} : vector<4x342xf32> to vector<4x288xf32>
    %cst_22 = arith.constant dense<0.000000e+00> : vector<8x288xf32>
    %34 = tpu.matmul %32, %33, %cst_22 {dimension_numbers = #tpu.dot_dimension_numbers<[1], [0], [0], [1], [0, 0, 1, 1], [], []>} : vector<8x4xf32>, vector<4x288xf32>, vector<8x288xf32> -> vector<8x288xf32>
    %35 = arith.addf %30, %34 : vector<8x288xf32>
    %c6 = arith.constant 6 : index
    %c0_23 = arith.constant 0 : index
    %c0_24 = arith.constant 0 : index
    %36 = vector.load %arg0[%c6, %c0_23, %c0_24] : memref<10x8x4xf32, #tpu.memory_space<vmem>>, vector<1x8x4xf32>
    %37 = vector.shape_cast %36 : vector<1x8x4xf32> to vector<8x4xf32>
    %38 = vector.extract_strided_slice %4 {offsets = [0, 36], sizes = [4, 288], strides = [1, 1]} : vector<4x342xf32> to vector<4x288xf32>
    %cst_25 = arith.constant dense<0.000000e+00> : vector<8x288xf32>
    %39 = tpu.matmul %37, %38, %cst_25 {dimension_numbers = #tpu.dot_dimension_numbers<[1], [0], [0], [1], [0, 0, 1, 1], [], []>} : vector<8x4xf32>, vector<4x288xf32>, vector<8x288xf32> -> vector<8x288xf32>
    %40 = arith.addf %35, %39 : vector<8x288xf32>
    %c7 = arith.constant 7 : index
    %c0_26 = arith.constant 0 : index
    %c0_27 = arith.constant 0 : index
    %41 = vector.load %arg0[%c7, %c0_26, %c0_27] : memref<10x8x4xf32, #tpu.memory_space<vmem>>, vector<1x8x4xf32>
    %42 = vector.shape_cast %41 : vector<1x8x4xf32> to vector<8x4xf32>
    %43 = vector.extract_strided_slice %4 {offsets = [0, 37], sizes = [4, 288], strides = [1, 1]} : vector<4x342xf32> to vector<4x288xf32>
    %cst_28 = arith.constant dense<0.000000e+00> : vector<8x288xf32>
    %44 = tpu.matmul %42, %43, %cst_28 {dimension_numbers = #tpu.dot_dimension_numbers<[1], [0], [0], [1], [0, 0, 1, 1], [], []>} : vector<8x4xf32>, vector<4x288xf32>, vector<8x288xf32> -> vector<8x288xf32>
    %45 = arith.addf %40, %44 : vector<8x288xf32>
    %c8 = arith.constant 8 : index
    %c0_29 = arith.constant 0 : index
    %c0_30 = arith.constant 0 : index
    %46 = vector.load %arg0[%c8, %c0_29, %c0_30] : memref<10x8x4xf32, #tpu.memory_space<vmem>>, vector<1x8x4xf32>
    %47 = vector.shape_cast %46 : vector<1x8x4xf32> to vector<8x4xf32>
    %48 = vector.extract_strided_slice %4 {offsets = [0, 38], sizes = [4, 288], strides = [1, 1]} : vector<4x342xf32> to vector<4x288xf32>
    %cst_31 = arith.constant dense<0.000000e+00> : vector<8x288xf32>
    %49 = tpu.matmul %47, %48, %cst_31 {dimension_numbers = #tpu.dot_dimension_numbers<[1], [0], [0], [1], [0, 0, 1, 1], [], []>} : vector<8x4xf32>, vector<4x288xf32>, vector<8x288xf32> -> vector<8x288xf32>
    %50 = arith.addf %45, %49 : vector<8x288xf32>
    %51 = vector.broadcast %2 : vector<8x1xf32> to vector<8x288xf32>
    %52 = arith.addf %50, %51 : vector<8x288xf32>
    %cst_32 = arith.constant 0.000000e+00 : f32
    %53 = vector.broadcast %cst_32 : f32 to vector<8x288xf32>
    %54 = arith.maximumf %52, %53 : vector<8x288xf32>
    %c0_33 = arith.constant 0 : index
    %c0_34 = arith.constant 0 : index
    %c0_35 = arith.constant 0 : index
    %55 = vector.load %arg2[%c0_33, %c0_34, %c0_35] : memref<2x8x288xf32, #tpu.memory_space<vmem>>, vector<1x8x288xf32>
    %56 = vector.shape_cast %55 : vector<1x8x288xf32> to vector<8x288xf32>
    %57 = vector.shape_cast %54 : vector<8x288xf32> to vector<1x8x288xf32>
    tpu.vector_store %arg2[%c0_33, %c0_34, %c0_35], %57 {strides = array<i32>} : memref<2x8x288xf32, #tpu.memory_space<vmem>>, vector<1x8x288xf32>,
    %c1_36 = arith.constant 1 : index
    %c0_37 = arith.constant 0 : index
    %c0_38 = arith.constant 0 : index
    %58 = vector.load %arg1[%c1_36, %c0_37, %c0_38] : memref<2x4x342xf32, #tpu.memory_space<vmem>>, vector<1x4x342xf32>
    %59 = vector.shape_cast %58 : vector<1x4x342xf32> to vector<4x342xf32>
    %cst_39 = arith.constant 0.000000e+00 : f32
    %60 = vector.broadcast %cst_39 : f32 to vector<8x288xf32>
    %c0_40 = arith.constant 0 : index
    %c0_41 = arith.constant 0 : index
    %c0_42 = arith.constant 0 : index
    %61 = vector.load %arg0[%c0_40, %c0_41, %c0_42] : memref<10x8x4xf32, #tpu.memory_space<vmem>>, vector<1x8x4xf32>
    %62 = vector.shape_cast %61 : vector<1x8x4xf32> to vector<8x4xf32>
    %63 = vector.extract_strided_slice %59 {offsets = [0, 0], sizes = [4, 288], strides = [1, 1]} : vector<4x342xf32> to vector<4x288xf32>
    %cst_43 = arith.constant dense<0.000000e+00> : vector<8x288xf32>
    %64 = tpu.matmul %62, %63, %cst_43 {dimension_numbers = #tpu.dot_dimension_numbers<[1], [0], [0], [1], [0, 0, 1, 1], [], []>} : vector<8x4xf32>, vector<4x288xf32>, vector<8x288xf32> -> vector<8x288xf32>
    %65 = arith.addf %60, %64 : vector<8x288xf32>
    %c1_44 = arith.constant 1 : index
    %c0_45 = arith.constant 0 : index
    %c0_46 = arith.constant 0 : index
    %66 = vector.load %arg0[%c1_44, %c0_45, %c0_46] : memref<10x8x4xf32, #tpu.memory_space<vmem>>, vector<1x8x4xf32>
    %67 = vector.shape_cast %66 : vector<1x8x4xf32> to vector<8x4xf32>
    %68 = vector.extract_strided_slice %59 {offsets = [0, 1], sizes = [4, 288], strides = [1, 1]} : vector<4x342xf32> to vector<4x288xf32>
    %cst_47 = arith.constant dense<0.000000e+00> : vector<8x288xf32>
    %69 = tpu.matmul %67, %68, %cst_47 {dimension_numbers = #tpu.dot_dimension_numbers<[1], [0], [0], [1], [0, 0, 1, 1], [], []>} : vector<8x4xf32>, vector<4x288xf32>, vector<8x288xf32> -> vector<8x288xf32>
    %70 = arith.addf %65, %69 : vector<8x288xf32>
    %c2_48 = arith.constant 2 : index
    %c0_49 = arith.constant 0 : index
    %c0_50 = arith.constant 0 : index
    %71 = vector.load %arg0[%c2_48, %c0_49, %c0_50] : memref<10x8x4xf32, #tpu.memory_space<vmem>>, vector<1x8x4xf32>
    %72 = vector.shape_cast %71 : vector<1x8x4xf32> to vector<8x4xf32>
    %73 = vector.extract_strided_slice %59 {offsets = [0, 2], sizes = [4, 288], strides = [1, 1]} : vector<4x342xf32> to vector<4x288xf32>
    %cst_51 = arith.constant dense<0.000000e+00> : vector<8x288xf32>
    %74 = tpu.matmul %72, %73, %cst_51 {dimension_numbers = #tpu.dot_dimension_numbers<[1], [0], [0], [1], [0, 0, 1, 1], [], []>} : vector<8x4xf32>, vector<4x288xf32>, vector<8x288xf32> -> vector<8x288xf32>
    %75 = arith.addf %70, %74 : vector<8x288xf32>
    %c3_52 = arith.constant 3 : index
    %c0_53 = arith.constant 0 : index
    %c0_54 = arith.constant 0 : index
    %76 = vector.load %arg0[%c3_52, %c0_53, %c0_54] : memref<10x8x4xf32, #tpu.memory_space<vmem>>, vector<1x8x4xf32>
    %77 = vector.shape_cast %76 : vector<1x8x4xf32> to vector<8x4xf32>
    %78 = vector.extract_strided_slice %59 {offsets = [0, 18], sizes = [4, 288], strides = [1, 1]} : vector<4x342xf32> to vector<4x288xf32>
    %cst_55 = arith.constant dense<0.000000e+00> : vector<8x288xf32>
    %79 = tpu.matmul %77, %78, %cst_55 {dimension_numbers = #tpu.dot_dimension_numbers<[1], [0], [0], [1], [0, 0, 1, 1], [], []>} : vector<8x4xf32>, vector<4x288xf32>, vector<8x288xf32> -> vector<8x288xf32>
    %80 = arith.addf %75, %79 : vector<8x288xf32>
    %c4_56 = arith.constant 4 : index
    %c0_57 = arith.constant 0 : index
    %c0_58 = arith.constant 0 : index
    %81 = vector.load %arg0[%c4_56, %c0_57, %c0_58] : memref<10x8x4xf32, #tpu.memory_space<vmem>>, vector<1x8x4xf32>
    %82 = vector.shape_cast %81 : vector<1x8x4xf32> to vector<8x4xf32>
    %83 = vector.extract_strided_slice %59 {offsets = [0, 19], sizes = [4, 288], strides = [1, 1]} : vector<4x342xf32> to vector<4x288xf32>
    %cst_59 = arith.constant dense<0.000000e+00> : vector<8x288xf32>
    %84 = tpu.matmul %82, %83, %cst_59 {dimension_numbers = #tpu.dot_dimension_numbers<[1], [0], [0], [1], [0, 0, 1, 1], [], []>} : vector<8x4xf32>, vector<4x288xf32>, vector<8x288xf32> -> vector<8x288xf32>
    %85 = arith.addf %80, %84 : vector<8x288xf32>
    %c5_60 = arith.constant 5 : index
    %c0_61 = arith.constant 0 : index
    %c0_62 = arith.constant 0 : index
    %86 = vector.load %arg0[%c5_60, %c0_61, %c0_62] : memref<10x8x4xf32, #tpu.memory_space<vmem>>, vector<1x8x4xf32>
    %87 = vector.shape_cast %86 : vector<1x8x4xf32> to vector<8x4xf32>
    %88 = vector.extract_strided_slice %59 {offsets = [0, 20], sizes = [4, 288], strides = [1, 1]} : vector<4x342xf32> to vector<4x288xf32>
    %cst_63 = arith.constant dense<0.000000e+00> : vector<8x288xf32>
    %89 = tpu.matmul %87, %88, %cst_63 {dimension_numbers = #tpu.dot_dimension_numbers<[1], [0], [0], [1], [0, 0, 1, 1], [], []>} : vector<8x4xf32>, vector<4x288xf32>, vector<8x288xf32> -> vector<8x288xf32>
    %90 = arith.addf %85, %89 : vector<8x288xf32>
    %c6_64 = arith.constant 6 : index
    %c0_65 = arith.constant 0 : index
    %c0_66 = arith.constant 0 : index
    %91 = vector.load %arg0[%c6_64, %c0_65, %c0_66] : memref<10x8x4xf32, #tpu.memory_space<vmem>>, vector<1x8x4xf32>
    %92 = vector.shape_cast %91 : vector<1x8x4xf32> to vector<8x4xf32>
    %93 = vector.extract_strided_slice %59 {offsets = [0, 36], sizes = [4, 288], strides = [1, 1]} : vector<4x342xf32> to vector<4x288xf32>
    %cst_67 = arith.constant dense<0.000000e+00> : vector<8x288xf32>
    %94 = tpu.matmul %92, %93, %cst_67 {dimension_numbers = #tpu.dot_dimension_numbers<[1], [0], [0], [1], [0, 0, 1, 1], [], []>} : vector<8x4xf32>, vector<4x288xf32>, vector<8x288xf32> -> vector<8x288xf32>
    %95 = arith.addf %90, %94 : vector<8x288xf32>
    %c7_68 = arith.constant 7 : index
    %c0_69 = arith.constant 0 : index
    %c0_70 = arith.constant 0 : index
    %96 = vector.load %arg0[%c7_68, %c0_69, %c0_70] : memref<10x8x4xf32, #tpu.memory_space<vmem>>, vector<1x8x4xf32>
    %97 = vector.shape_cast %96 : vector<1x8x4xf32> to vector<8x4xf32>
    %98 = vector.extract_strided_slice %59 {offsets = [0, 37], sizes = [4, 288], strides = [1, 1]} : vector<4x342xf32> to vector<4x288xf32>
    %cst_71 = arith.constant dense<0.000000e+00> : vector<8x288xf32>
    %99 = tpu.matmul %97, %98, %cst_71 {dimension_numbers = #tpu.dot_dimension_numbers<[1], [0], [0], [1], [0, 0, 1, 1], [], []>} : vector<8x4xf32>, vector<4x288xf32>, vector<8x288xf32> -> vector<8x288xf32>
    %100 = arith.addf %95, %99 : vector<8x288xf32>
    %c8_72 = arith.constant 8 : index
    %c0_73 = arith.constant 0 : index
    %c0_74 = arith.constant 0 : index
    %101 = vector.load %arg0[%c8_72, %c0_73, %c0_74] : memref<10x8x4xf32, #tpu.memory_space<vmem>>, vector<1x8x4xf32>
    %102 = vector.shape_cast %101 : vector<1x8x4xf32> to vector<8x4xf32>
    %103 = vector.extract_strided_slice %59 {offsets = [0, 38], sizes = [4, 288], strides = [1, 1]} : vector<4x342xf32> to vector<4x288xf32>
    %cst_75 = arith.constant dense<0.000000e+00> : vector<8x288xf32>
    %104 = tpu.matmul %102, %103, %cst_75 {dimension_numbers = #tpu.dot_dimension_numbers<[1], [0], [0], [1], [0, 0, 1, 1], [], []>} : vector<8x4xf32>, vector<4x288xf32>, vector<8x288xf32> -> vector<8x288xf32>
    %105 = arith.addf %100, %104 : vector<8x288xf32>
    %106 = vector.broadcast %2 : vector<8x1xf32> to vector<8x288xf32>
    %107 = arith.addf %105, %106 : vector<8x288xf32>
    %cst_76 = arith.constant 0.000000e+00 : f32
    %108 = vector.broadcast %cst_76 : f32 to vector<8x288xf32>
    %109 = arith.maximumf %107, %108 : vector<8x288xf32>
    %c1_77 = arith.constant 1 : index
    %c0_78 = arith.constant 0 : index
    %c0_79 = arith.constant 0 : index
    %110 = vector.load %arg2[%c1_77, %c0_78, %c0_79] : memref<2x8x288xf32, #tpu.memory_space<vmem>>, vector<1x8x288xf32>
    %111 = vector.shape_cast %110 : vector<1x8x288xf32> to vector<8x288xf32>
    %112 = vector.shape_cast %109 : vector<8x288xf32> to vector<1x8x288xf32>
    tpu.vector_store %arg2[%c1_77, %c0_78, %c0_79], %112 {strides = array<i32>} : memref<2x8x288xf32, #tpu.memory_space<vmem>>, vector<1x8x288xf32>,
    return
  }
}

</mosaic_0001>

<bundles_post_ra>
// kernel: conv2d_relu.1
= control target key start
LH: loop header
LB: loop body
LE: loop exit
PB: predicated region body
PF: predicated region fallthrough
CT: control target
= control target key end

     0   :  { %v3243_v1 = vmov 0.0   ;;  %s3244_s11 = smov 127   ;;  %vm3245_vm0 = vmmov 0   ;;  %s3246_s14 = smov 126   ;;  %vm34_vm1 = vcmask 1043456   ;;  %vm27_vm2 = vcmask 1039360   ;;  %s3701_s1 = inlined_call_operand.vmem [shape: f32[2,4,342], index: 1, kind: input, shape index: {}]   ;;  %s3702_s0 = inlined_call_operand.vmem [shape: f32[10,8,4], index: 0, kind: input, shape index: {}]   ;;  %s3703_s2 = inlined_call_operand.vmem [shape: f32[2,8,288], index: 2, kind: output, shape index: {}]  }
   0x1   :  { %v3272_v0 = vld [vmem:[%s3701_s1] sm:$0xff]  ;;  %3107 = vmatprep.subr.mxu1 %v3243_v1  ;;  %105 = vmatprep.mubr.f32.mxu0 %v3243_v1  ;;  %v3289_v3 = vld [vmem:[%s3701_s1 + $0x8] sm:$0xf]  ;;  %s3247_s15 = smov 110   ;;  %s3248_s16 = smov 109   ;;  %v3334_v4 = vld [vmem:[%s3701_s1 + $0xc] sm:$0xff] }
   0x2   :  { %21 = vrot.lane.b32.xlu1 %v3272_v0, %s3244_s11  ;;  %v3280_v2 = vcombine.high %v3272_v0, %v3272_v0  ;;  %3109 = vmatprep.mubr.msk.f32.mxu1 %vm3245_vm0, %v3243_v1  ;;  %s3249_s17 = smov 108   ;;  %s3250_s18 = smov 92   ;;  %v3341_v5 = vld [vmem:[%s3701_s1 + $0x14] sm:$0xf]  ;;  %v3347_v6 = vcombine.high %v3334_v4, %v3334_v4  ;;  %v3402_v12 = vld [vmem:[%s3702_s0 + $0x8] sm:$0xff]  ;;  %vm30_vm3 = vcmask 31744  }
   0x3   :  { %s3251_s19 = smov 91   ;;  %s3252_s20 = smov 90   ;;  %vm340_vm4 = vcmask 1031168   ;;  %v3427_v18 = vld [vmem:[%s3702_s0] sm:$0xff]  ;;  %vm504_vm5 = vcmask 900096   ;;  %v2959_v20 = vld [vmem:[%s3702_s0 + $0x48] sm:$0xff] }
   0x4   :  { %23 = vrot.lane.b32.xlu0 %v3280_v2, %s3244_s11  ;;  %v3253_v23 = vmov 0   ;;  %v3443_v25 = vld [vmem:[%s3702_s0 + $0x10] sm:$0xff]  ;;  %v3459_v28 = vld [vmem:[%s3702_s0 + $0x18] sm:$0xff]  ;;  %vm668_vm6 = vcmask 891904   ;;  %v3472_v33 = vld [vmem:[%s3702_s0 + $0x20] sm:$0xff]  ;;  %vm832_vm7 = vcmask 883712  }
   0x5   :  { %3240 = vset.pattern.permute.xlu0 %v3253_v23  ;;  %v3488_v36 = vld [vmem:[%s3702_s0 + $0x28] sm:$0xff]  ;;  %v3505_v43 = vld [vmem:[%s3702_s0 + $0x30] sm:$0xff]  ;;  %vm996_vm8 = vcmask 752640   ;;  %v3518_v47 = vld [vmem:[%s3702_s0 + $0x38] sm:$0xff]  ;;  %vm1160_vm9 = vcmask 744448   ;;  %vm1324_vm10 = vcmask 736256  }
   0x6   :  { %336 = vrot.lane.b32.xlu1 %v3280_v2, %s3246_s14  ;;  %v3533_v51 = vld [vmem:[%s3702_s0 + $0x40] sm:$0xff]  ;;  %vm1493_vm11 = vcmask 261120  }
   0x8   :  { %25 = vrot.lane.b32.xlu0 %v3289_v3, %s3244_s11 }
   0xa   :  { %334 = vrot.lane.b32.xlu1 %v3272_v0, %s3246_s14 }
   0xc   :  { %338 = vrot.lane.b32.xlu0 %v3289_v3, %s3246_s14 }
   0xe   :  { %502 = vrot.lane.b32.xlu1 %v3289_v3, %s3247_s15 }
  0x10   :  { %500 = vrot.lane.b32.xlu0 %v3280_v2, %s3247_s15 }
  0x12   :  { %664 = vrot.lane.b32.xlu1 %v3280_v2, %s3248_s16 }
  0x14   :  { %498 = vrot.lane.b32.xlu0 %v3272_v0, %s3247_s15 }
  0x16   :  { %662 = vrot.lane.b32.xlu1 %v3272_v0, %s3248_s16 }
  0x18   :  { %666 = vrot.lane.b32.xlu0 %v3289_v3, %s3248_s16 }
  0x1a   :  { %830 = vrot.lane.b32.xlu1 %v3289_v3, %s3249_s17 }
  0x1c   :  { %828 = vrot.lane.b32.xlu0 %v3280_v2, %s3249_s17 }
  0x1e   :  { %992 = vrot.lane.b32.xlu1 %v3280_v2, %s3250_s18 }
  0x20   :  { %826 = vrot.lane.b32.xlu0 %v3272_v0, %s3249_s17 }
  0x22   :  { %990 = vrot.lane.b32.xlu1 %v3272_v0, %s3250_s18 }
  0x24   :  { %994 = vrot.lane.b32.xlu0 %v3289_v3, %s3250_s18 }
  0x26   :  { %1158 = vrot.lane.b32.xlu1 %v3289_v3, %s3251_s19 }
  0x28   :  { %1156 = vrot.lane.b32.xlu0 %v3280_v2, %s3251_s19 }
  0x2a   :  { %1320 = vrot.lane.b32.xlu1 %v3280_v2, %s3252_s20 }
  0x2c   :  { %1154 = vrot.lane.b32.xlu0 %v3272_v0, %s3251_s19 }
  0x2e   :  { %1318 = vrot.lane.b32.xlu1 %v3272_v0, %s3252_s20 }
  0x30   :  { %1322 = vrot.lane.b32.xlu0 %v3289_v3, %s3252_s20 }
  0x32   :  { %1507 = vrot.lane.b32.xlu1 %v3341_v5, %s3244_s11 }
  0x34   :  { %1505 = vrot.lane.b32.xlu0 %v3347_v6, %s3244_s11 }
  0x36   :  { %1814 = vrot.lane.b32.xlu1 %v3347_v6, %s3246_s14 }
  0x38   :  { %1503 = vrot.lane.b32.xlu0 %v3334_v4, %s3244_s11 }
  0x3a   :  { %1812 = vrot.lane.b32.xlu1 %v3334_v4, %s3246_s14 }
  0x3c   :  { %1816 = vrot.lane.b32.xlu0 %v3341_v5, %s3246_s14 }
  0x3e   :  { %1978 = vrot.lane.b32.xlu1 %v3341_v5, %s3247_s15 }
  0x40   :  { %1976 = vrot.lane.b32.xlu0 %v3347_v6, %s3247_s15 }
  0x42   :  { %2138 = vrot.lane.b32.xlu1 %v3347_v6, %s3248_s16 }
  0x44   :  { %1974 = vrot.lane.b32.xlu0 %v3334_v4, %s3247_s15 }
  0x46   :  { %2136 = vrot.lane.b32.xlu1 %v3334_v4, %s3248_s16 }
  0x48   :  { %2140 = vrot.lane.b32.xlu0 %v3341_v5, %s3248_s16 }
  0x4a   :  { %2302 = vrot.lane.b32.xlu1 %v3341_v5, %s3249_s17 }
  0x4c   :  { %2300 = vrot.lane.b32.xlu0 %v3347_v6, %s3249_s17 }
  0x4e   :  { %2462 = vrot.lane.b32.xlu1 %v3347_v6, %s3250_s18 }
  0x50   :  { %2298 = vrot.lane.b32.xlu0 %v3334_v4, %s3249_s17 }
  0x52   :  { %2460 = vrot.lane.b32.xlu1 %v3334_v4, %s3250_s18 }
  0x54   :  { %2464 = vrot.lane.b32.xlu0 %v3341_v5, %s3250_s18 }
  0x56   :  { %2626 = vrot.lane.b32.xlu1 %v3341_v5, %s3251_s19 }
  0x58   :  { %2624 = vrot.lane.b32.xlu0 %v3347_v6, %s3251_s19 }
  0x5a   :  { %2786 = vrot.lane.b32.xlu1 %v3347_v6, %s3252_s20 }
  0x5c   :  { %2622 = vrot.lane.b32.xlu0 %v3334_v4, %s3251_s19 }
  0x5e   :  { %2784 = vrot.lane.b32.xlu1 %v3334_v4, %s3252_s20 }
  0x60   :  { %2788 = vrot.lane.b32.xlu0 %v3341_v5, %s3252_s20 }
  0x64   :  { %1482 = vperm.xlu0 %3240, %v2959_v20  }
  0x74   :  { %v22_v7 = vpop.permute.xlu1 %21 }
  0x76   :  { %v24_v8 = vpop.permute.xlu0 %23 }
  0x77   :  { %v28_v13 = vsel %vm27_vm2, %v22_v7, %v24_v8 }
  0x78   :  { %v337_v9 = vpop.permute.xlu1 %336 }
  0x7a   :  { %v26_v10 = vpop.permute.xlu0 %25 }
  0x7b   :  { %3108 = vmatpush3.msk.msra.mxu1 %vm34_vm1, %v26_v10  ;;  %v29_v11 = vsel %vm27_vm2, %v24_v8, %v26_v10 }
  0x7c   :  { %2961 = vmatprep.subr.msk.mxu0 %vm34_vm1, %v29_v11  ;;  %v335_v14 = vpop.permute.xlu1 %334  ;;  %3110 = vmatmul.mubr.msk.f32.vlgmr.msra.gmra.mrb[0].mxu1 %vm30_vm3, %v3402_v12 }
  0x7d   :  { %2962 = vmatpush1.msk.msra.mxu0 %vm34_vm1, %v28_v13  ;;  %3112 = vmatprep.subr.mxu1 %v3243_v1  ;;  %v341_v21 = vsel %vm340_vm4, %v335_v14, %v337_v9 }
  0x7e   :  { %2963 = vmatmul.mubr.msk.f32.vlgmr.msra.gmra.mrb[0].mxu0 %vm30_vm3, %v3402_v12  ;;  %2966 = vmatprep.subr.msk.mxu0 %vm34_vm1, %v3280_v2  ;;  %v339_v15 = vpop.permute.xlu0 %338 }
  0x7f   :  { %2967 = vmatpush1.msk.msra.mxu0 %vm34_vm1, %v3272_v0  ;;  %v342_v16 = vsel %vm340_vm4, %v337_v9, %v339_v15  ;;  %3113 = vmatpush3.msk.msra.mxu1 %vm34_vm1, %v3289_v3 }
  0x80   :  { %2972 = vmatprep.subr.msk.mxu0 %vm34_vm1, %v342_v16  ;;  %3114 = vmatprep.mubr.msk.f32.mxu1 %vm3245_vm0, %v3243_v1  ;;  %v503_v17 = vpop.permute.xlu1 %502 }
  0x81   :  { %3117 = vmatprep.subr.mxu1 %v3243_v1  ;;  %255 = vmatprep.mubr.f32.mxu0 %v3243_v1 }
  0x82   :  { %v501_v19 = vpop.permute.xlu0 %500  ;;  %3115 = vmatmul.mubr.msk.f32.vlgmr.msra.gmra.mrb[2].mxu1 %vm30_vm3, %v3427_v18 }
  0x83   :  { %3118 = vmatpush3.msk.msra.mxu1 %vm34_vm1, %v339_v15  ;;  %3119 = vmatprep.mubr.msk.f32.mxu1 %vm3245_vm0, %v3243_v1  ;;  %v506_v24 = vsel %vm504_vm5, %v501_v19, %v503_v17 }
  0x84   :  { %3122 = vmatprep.subr.mxu1 %v3243_v1  ;;  %v665_v22 = vpop.permute.xlu1 %664 }
  0x86   :  { %2968 = vmatmul.mubr.msk.f32.vlgmr.msra.gmra.mrb[0].mxu0 %vm30_vm3, %v3427_v18  ;;  %v499_v26 = vpop.permute.xlu0 %498  ;;  %3120 = vmatmul.mubr.msk.f32.vlgmr.msra.gmra.mrb[4].mxu1 %vm30_vm3, %v3443_v25 }
  0x87   :  { %2973 = vmatpush1.msk.msra.mxu0 %vm34_vm1, %v341_v21  ;;  %416 = vmatprep.mubr.f32.mxu0 %v3243_v1  ;;  %v505_v30 = vsel %vm504_vm5, %v499_v26, %v501_v19 }
  0x88   :  { %2978 = vmatprep.subr.msk.mxu0 %vm34_vm1, %v506_v24  ;;  %3123 = vmatpush3.msk.msra.mxu1 %vm34_vm1, %v503_v17  ;;  %v663_v27 = vpop.permute.xlu1 %662 }
  0x89   :  { %3124 = vmatprep.mubr.msk.f32.mxu1 %vm3245_vm0, %v3243_v1  ;;  %3127 = vmatprep.subr.mxu1 %v3243_v1  ;;  %v669_v38 = vsel %vm668_vm6, %v663_v27, %v665_v22 }
  0x8a   :  { %v667_v29 = vpop.permute.xlu0 %666  ;;  %3125 = vmatmul.mubr.msk.f32.vlgmr.msra.gmra.mrb[6].mxu1 %vm30_vm3, %v3459_v28 }
  0x8b   :  { %3128 = vmatpush3.msk.msra.mxu1 %vm34_vm1, %v667_v29  ;;  %3129 = vmatprep.mubr.msk.f32.mxu1 %vm3245_vm0, %v3243_v1  ;;  %v670_v32 = vsel %vm668_vm6, %v665_v22, %v667_v29 }
  0x8c   :  { %v831_v31 = vpop.permute.xlu1 %830  ;;  %3132 = vmatprep.subr.mxu1 %v3243_v1 }
  0x8e   :  { %2974 = vmatmul.mubr.msk.f32.vlgmr.msra.gmra.mrb[0].mxu0 %vm30_vm3, %v3443_v25  ;;  %v829_v34 = vpop.permute.xlu0 %828  ;;  %3130 = vmatmul.mubr.msk.f32.vlgmr.msra.gmra.mrb[8].mxu1 %vm30_vm3, %v3472_v33 }
  0x8f   :  { %2979 = vmatpush1.msk.msra.mxu0 %vm34_vm1, %v505_v30  ;;  %580 = vmatprep.mubr.f32.mxu0 %v3243_v1  ;;  %v834_v40 = vsel %vm832_vm7, %v829_v34, %v831_v31 }
  0x90   :  { %2984 = vmatprep.subr.msk.mxu0 %vm34_vm1, %v670_v32  ;;  %v993_v35 = vpop.permute.xlu1 %992  ;;  %3133 = vmatpush3.msk.msra.mxu1 %vm34_vm1, %v831_v31 }
  0x91   :  { %3134 = vmatprep.mubr.msk.f32.mxu1 %vm3245_vm0, %v3243_v1  ;;  %3137 = vmatprep.subr.mxu1 %v3243_v1 }
  0x92   :  { %v827_v37 = vpop.permute.xlu0 %826  ;;  %3135 = vmatmul.mubr.msk.f32.vlgmr.msra.gmra.mrb[10].mxu1 %vm30_vm3, %v3488_v36 }
  0x93   :  { %3139 = vmatprep.mubr.msk.f32.mxu1 %vm3245_vm0, %v3243_v1  ;;  %v833_v45 = vsel %vm832_vm7, %v827_v37, %v829_v34 }
  0x94   :  { %v991_v39 = vpop.permute.xlu1 %990 }
  0x95   :  { %v997_v53 = vsel %vm996_vm8, %v991_v39, %v993_v35 }
  0x96   :  { %2980 = vmatmul.mubr.msk.f32.vlgmr.msra.gmra.mrb[0].mxu0 %vm30_vm3, %v3459_v28  ;;  %v995_v41 = vpop.permute.xlu0 %994 }
  0x97   :  { %2985 = vmatpush1.msk.msra.mxu0 %vm34_vm1, %v669_v38  ;;  %744 = vmatprep.mubr.f32.mxu0 %v3243_v1  ;;  %v998_v48 = vsel %vm996_vm8, %v993_v35, %v995_v41 }
  0x98   :  { %2990 = vmatprep.subr.msk.mxu0 %vm34_vm1, %v834_v40  ;;  %3138 = vmatpush3.msk.msra.mxu1 %vm34_vm1, %v995_v41  ;;  %v1159_v42 = vpop.permute.xlu1 %1158 }
  0x99   :  { %3142 = vmatprep.subr.mxu1 %v3243_v1  ;;  %3140 = vmatmul.mubr.msk.f32.vlgmr.msra.gmra.mrb[12].mxu1 %vm30_vm3, %v3505_v43 }
  0x9a   :  { %v1157_v44 = vpop.permute.xlu0 %1156  ;;  %3143 = vmatpush3.msk.msra.mxu1 %vm34_vm1, %v1159_v42  ;;  %3144 = vmatprep.mubr.msk.f32.mxu1 %vm3245_vm0, %v3243_v1 }
  0x9b   :  { %3147 = vmatprep.subr.mxu1 %v3243_v1  ;;  %v1162_v55 = vsel %vm1160_vm9, %v1157_v44, %v1159_v42 }
  0x9c   :  { %v1321_v46 = vpop.permute.xlu1 %1320 }
  0x9d   :  { %3145 = vmatmul.mubr.msk.f32.vlgmr.msra.gmra.mrb[14].mxu1 %vm30_vm3, %v3518_v47 }
  0x9e   :  { %2986 = vmatmul.mubr.msk.f32.vlgmr.msra.gmra.mrb[0].mxu0 %vm30_vm3, %v3472_v33  ;;  %v1155_v49 = vpop.permute.xlu0 %1154  ;;  %3149 = vmatprep.mubr.msk.f32.mxu1 %vm3245_vm0, %v3243_v1 }
  0x9f   :  { %2991 = vmatpush1.msk.msra.mxu0 %vm34_vm1, %v833_v45  ;;  %908 = vmatprep.mubr.f32.mxu0 %v3243_v1  ;;  %v1161_v59 = vsel %vm1160_vm9, %v1155_v49, %v1157_v44 }
  0xa0   :  { %2996 = vmatprep.subr.msk.mxu0 %vm34_vm1, %v998_v48  ;;  %v1319_v50 = vpop.permute.xlu1 %1318 }
  0xa1   :  { %v1325_v2 = vsel %vm1324_vm10, %v1319_v50, %v1321_v46 }
  0xa2   :  { %v1323_v52 = vpop.permute.xlu0 %1322 }
  0xa3   :  { %3148 = vmatpush3.msk.msra.mxu1 %vm34_vm1, %v1323_v52  ;;  %v1326_v61 = vsel %vm1324_vm10, %v1321_v46, %v1323_v52 }
  0xa4   :  { %v1508_v54 = vpop.permute.xlu1 %1507  ;;  %3152 = vmatprep.subr.mxu1 %v3243_v1  ;;  %3150 = vmatmul.mubr.msk.f32.vlgmr.msra.gmra.mrb[16].mxu1 %vm30_vm3, %v3533_v51 }
  0xa5   :  { %3153 = vmatpush3.msk.msra.mxu1 %vm34_vm1, %v1508_v54  ;;  %3154 = vmatprep.mubr.msk.f32.mxu1 %vm3245_vm0, %v3243_v1 }
  0xa6   :  { %2992 = vmatmul.mubr.msk.f32.vlgmr.msra.gmra.mrb[0].mxu0 %vm30_vm3, %v3488_v36  ;;  %v1506_v56 = vpop.permute.xlu0 %1505  ;;  %3157 = vmatprep.subr.mxu1 %v3243_v1 }
  0xa7   :  { %2997 = vmatpush1.msk.msra.mxu0 %vm34_vm1, %v997_v53  ;;  %1072 = vmatprep.mubr.f32.mxu0 %v3243_v1 }
  0xa8   :  { %3002 = vmatprep.subr.msk.mxu0 %vm34_vm1, %v1162_v55  ;;  %v3550_v57 = vpop.permute.xlu1 %1814  ;;  %3155 = vmatmul.mubr.msk.f32.vlgmr.msra.gmra.mrb[18].mxu1 %vm30_vm3, %v3402_v12 }
  0xa9   :  { %3158 = vmatpush3.msk.msra.mxu1 %vm34_vm1, %v3341_v5  ;;  %3159 = vmatprep.mubr.msk.f32.mxu1 %vm3245_vm0, %v3243_v1  ;;  %v1510_v5 = vsel %vm27_vm2, %v1506_v56, %v1508_v54 }
  0xaa   :  { %v1504_v58 = vpop.permute.xlu0 %1503  ;;  %3162 = vmatprep.subr.mxu1 %v3243_v1 }
  0xab   :  { %v1509_v10 = vsel %vm27_vm2, %v1504_v58, %v1506_v56 }
  0xac   :  { %v1813_v60 = vpop.permute.xlu1 %1812  ;;  %3160 = vmatmul.mubr.msk.f32.vlgmr.msra.gmra.mrb[20].mxu1 %vm30_vm3, %v3427_v18 }
  0xad   :  { %3164 = vmatprep.mubr.msk.f32.mxu1 %vm3245_vm0, %v3243_v1  ;;  %v1818_v19 = vsel %vm340_vm4, %v1813_v60, %v3550_v57 }
  0xae   :  { %2998 = vmatmul.mubr.msk.f32.vlgmr.msra.gmra.mrb[0].mxu0 %vm30_vm3, %v3505_v43  ;;  %v1817_v62 = vpop.permute.xlu0 %1816 }
  0xaf   :  { %3003 = vmatpush1.msk.msra.mxu0 %vm34_vm1, %v1161_v59  ;;  %1236 = vmatprep.mubr.f32.mxu0 %v3243_v1  ;;  %v1819_v15 = vsel %vm340_vm4, %v3550_v57, %v1817_v62 }
  0xb0   :  { %3008 = vmatprep.subr.msk.mxu0 %vm34_vm1, %v1326_v61  ;;  %3163 = vmatpush3.msk.msra.mxu1 %vm34_vm1, %v1817_v62  ;;  %v1979_v63 = vpop.permute.xlu1 %1978 }
  0xb1   :  { %3167 = vmatprep.subr.mxu1 %v3243_v1  ;;  %3165 = vmatmul.mubr.msk.f32.vlgmr.msra.gmra.mrb[22].mxu1 %vm30_vm3, %v3443_v25 }
  0xb2   :  { %v1977_v0 = vpop.permute.xlu0 %1976  ;;  %3168 = vmatpush3.msk.msra.mxu1 %vm34_vm1, %v1979_v63  ;;  %3169 = vmatprep.mubr.msk.f32.mxu1 %vm3245_vm0, %v3243_v1 }
  0xb3   :  { %3172 = vmatprep.subr.mxu1 %v3243_v1 }
  0xb4   :  { %v2139_v3 = vpop.permute.xlu1 %2138 }
  0xb5   :  { %3170 = vmatmul.mubr.msk.f32.vlgmr.msra.gmra.mrb[24].mxu1 %vm30_vm3, %v3459_v28 }
  0xb6   :  { %3004 = vmatmul.mubr.msk.f32.vlgmr.msra.gmra.mrb[0].mxu0 %vm30_vm3, %v3518_v47  ;;  %v1975_v7 = vpop.permute.xlu0 %1974  ;;  %3174 = vmatprep.mubr.msk.f32.mxu1 %vm3245_vm0, %v3243_v1 }
  0xb7   :  { %3009 = vmatpush1.msk.msra.mxu0 %vm34_vm1, %v1325_v2  ;;  %1400 = vmatprep.mubr.f32.mxu0 %v3243_v1  ;;  %v1980_v22 = vsel %vm504_vm5, %v1975_v7, %v1977_v0 }
  0xb8   :  { %3016 = vmatprep.subr.msk.mxu0 %vm34_vm1, %v1510_v5  ;;  %v2137_v8 = vpop.permute.xlu1 %2136 }
  0xb9   :  { %v2142_v24 = vsel %vm668_vm6, %v2137_v8, %v2139_v3 }
  0xba   :  { %v2141_v9 = vpop.permute.xlu0 %2140 }
  0xbb   :  { %3173 = vmatpush3.msk.msra.mxu1 %vm34_vm1, %v2141_v9 }
  0xbc   :  { %v2303_v11 = vpop.permute.xlu1 %2302  ;;  %3175 = vmatmul.mubr.msk.f32.vlgmr.msra.gmra.mrb[26].mxu1 %vm30_vm3, %v3472_v33  ;;  %3177 = vmatprep.subr.mxu1 %v3243_v1 }
  0xbd   :  { %3178 = vmatpush3.msk.msra.mxu1 %vm34_vm1, %v2303_v11  ;;  %3179 = vmatprep.mubr.msk.f32.mxu1 %vm3245_vm0, %v3243_v1 }
  0xbe   :  { %3010 = vmatmul.mubr.msk.f32.vlgmr.msra.gmra.mrb[0].mxu0 %vm30_vm3, %v3533_v51  ;;  %v2301_v13 = vpop.permute.xlu0 %2300  ;;  %3182 = vmatprep.subr.mxu1 %v3243_v1 }
  0xbf   :  { %3017 = vmatpush1.msk.msra.mxu0 %vm34_vm1, %v1509_v10  ;;  %1584 = vmatprep.mubr.f32.mxu0 %v3243_v1  ;;  %v2305_v26 = vsel %vm832_vm7, %v2301_v13, %v2303_v11 }
  0xc0   :  { %3021 = vmatprep.subr.msk.mxu0 %vm34_vm1, %v3347_v6  ;;  %v2463_v14 = vpop.permute.xlu1 %2462  ;;  %3180 = vmatmul.mubr.msk.f32.vlgmr.msra.gmra.mrb[28].mxu1 %vm30_vm3, %v3488_v36 }
  0xc1   :  { %3184 = vmatprep.mubr.msk.f32.mxu1 %vm3245_vm0, %v3243_v1 }
  0xc2   :  { %3018 = vmatmul.mubr.msk.f32.vlgmr.msra.gmra.mrb[2].mxu0 %vm30_vm3, %v3402_v12  ;;  %v2299_v16 = vpop.permute.xlu0 %2298  ;;  %v1981_v12 = vsel %vm504_vm5, %v1977_v0, %v1979_v63 }
  0xc3   :  { %3022 = vmatpush1.msk.msra.mxu0 %vm34_vm1, %v3334_v4  ;;  %1734 = vmatprep.mubr.f32.mxu0 %v3243_v1 }
  0xc4   :  { %3027 = vmatprep.subr.msk.mxu0 %vm34_vm1, %v1819_v15  ;;  %v2461_v6 = vpop.permute.xlu1 %2460 }
  0xc6   :  { %v2465_v17 = vpop.permute.xlu0 %2464 }
  0xc7   :  { %3183 = vmatpush3.msk.msra.mxu1 %vm34_vm1, %v2465_v17  ;;  %v2467_v27 = vsel %vm996_vm8, %v2463_v14, %v2465_v17 }
  0xc8   :  { %3185 = vmatmul.mubr.msk.f32.vlgmr.msra.gmra.mrb[30].mxu1 %vm30_vm3, %v3505_v43  ;;  %v2627_v20 = vpop.permute.xlu1 %2626  ;;  %3187 = vmatprep.subr.mxu1 %v3243_v1 }
  0xc9   :  { %3188 = vmatpush3.msk.msra.mxu1 %vm34_vm1, %v2627_v20  ;;  %3189 = vmatprep.mubr.msk.f32.mxu1 %vm3245_vm0, %v3243_v1 }
  0xca   :  { %3023 = vmatmul.mubr.msk.f32.vlgmr.msra.gmra.mrb[2].mxu0 %vm30_vm3, %v3427_v18  ;;  %v2625_v4 = vpop.permute.xlu0 %2624  ;;  %3192 = vmatprep.subr.mxu1 %v3243_v1  ;;  %v2143_v18 = vsel %vm668_vm6, %v2139_v3, %v2141_v9 }
  0xcb   :  { %3028 = vmatpush1.msk.msra.mxu0 %vm34_vm1, %v1818_v19  ;;  %1893 = vmatprep.mubr.f32.mxu0 %v3243_v1  ;;  %v2629_v29 = vsel %vm1160_vm9, %v2625_v4, %v2627_v20 }
  0xcc   :  { %3033 = vmatprep.subr.msk.mxu0 %vm34_vm1, %v1981_v12  ;;  %3190 = vmatmul.mubr.msk.f32.vlgmr.msra.gmra.mrb[32].mxu1 %vm30_vm3, %v3518_v47  ;;  %v2787_v30 = vpop.permute.xlu1 %2786 }
  0xcd   :  { %3194 = vmatprep.mubr.msk.f32.mxu1 %vm3245_vm0, %v3243_v1 }
  0xce   :  { %v2623_v21 = vpop.permute.xlu0 %2622 }
  0xcf   :  { %v2628_v31 = vsel %vm1160_vm9, %v2623_v21, %v2625_v4 }
  0xd2   :  { %3029 = vmatmul.mubr.msk.f32.vlgmr.msra.gmra.mrb[2].mxu0 %vm30_vm3, %v3443_v25  ;;  %v2789_v23 = vpop.permute.xlu0 %2788  ;;  %v2304_v25 = vsel %vm832_vm7, %v2299_v16, %v2301_v13 }
  0xd3   :  { %3034 = vmatpush1.msk.msra.mxu0 %vm34_vm1, %v1980_v22  ;;  %2055 = vmatprep.mubr.f32.mxu0 %v3243_v1  ;;  %v2791_v32 = vsel %vm1324_vm10, %v2787_v30, %v2789_v23 }
  0xd4   :  { %3039 = vmatprep.subr.msk.mxu0 %vm34_vm1, %v2143_v18  ;;  %3193 = vmatpush3.msk.msra.mxu1 %vm34_vm1, %v2789_v23 }
  0xd5   :  { %3195 = vmatmul.mubr.msk.f32.vlgmr.msra.gmra.mrb[34].mxu1 %vm30_vm3, %v3533_v51 }
  0xda   :  { %3035 = vmatmul.mubr.msk.f32.vlgmr.msra.gmra.mrb[2].mxu0 %vm30_vm3, %v3459_v28  ;;  %v2466_v28 = vsel %vm996_vm8, %v2461_v6, %v2463_v14 }
  0xdb   :  { %3040 = vmatpush1.msk.msra.mxu0 %vm34_vm1, %v2142_v24  ;;  %2217 = vmatprep.mubr.f32.mxu0 %v3243_v1 }
  0xdc   :  { %3045 = vmatprep.subr.msk.mxu0 %vm34_vm1, %v2305_v26 }
  0xe2   :  { %3041 = vmatmul.mubr.msk.f32.vlgmr.msra.gmra.mrb[2].mxu0 %vm30_vm3, %v3472_v33  ;;  %v2785_v33 = vpop.permute.xlu1 %2784 }
  0xe3   :  { %3046 = vmatpush1.msk.msra.mxu0 %vm34_vm1, %v2304_v25  ;;  %2379 = vmatprep.mubr.f32.mxu0 %v3243_v1  ;;  %v2790_v34 = vsel %vm1324_vm10, %v2785_v33, %v2787_v30  ;;  %v1483_v60 = vpop.permute.xlu0 %1482 }
  0xe4   :  { %3051 = vmatprep.subr.msk.mxu0 %vm34_vm1, %v2467_v27 }
  0xea   :  { %3047 = vmatmul.mubr.msk.f32.vlgmr.msra.gmra.mrb[2].mxu0 %vm30_vm3, %v3488_v36 }
  0xeb   :  { %3052 = vmatpush1.msk.msra.mxu0 %vm34_vm1, %v2466_v28  ;;  %2541 = vmatprep.mubr.f32.mxu0 %v3243_v1 }
  0xec   :  { %3057 = vmatprep.subr.msk.mxu0 %vm34_vm1, %v2629_v29 }
  0xf2   :  { %3053 = vmatmul.mubr.msk.f32.vlgmr.msra.gmra.mrb[2].mxu0 %vm30_vm3, %v3505_v43 }
  0xf3   :  { %3058 = vmatpush1.msk.msra.mxu0 %vm34_vm1, %v2628_v31  ;;  %2703 = vmatprep.mubr.f32.mxu0 %v3243_v1 }
  0xf4   :  { %3063 = vmatprep.subr.msk.mxu0 %vm34_vm1, %v2791_v32 }
  0xfa   :  { %3059 = vmatmul.mubr.msk.f32.vlgmr.msra.gmra.mrb[2].mxu0 %vm30_vm3, %v3518_v47 }
  0xfb   :  { %3064 = vmatpush1.msk.msra.mxu0 %vm34_vm1, %v2790_v34  ;;  %2865 = vmatprep.mubr.f32.mxu0 %v3243_v1 }
 0x102   :  { %3065 = vmatmul.mubr.msk.f32.vlgmr.msra.gmra.mrb[2].mxu0 %vm30_vm3, %v3533_v51 }
 0x14f   :  { %v178_v35 = vpop.f32.mrb[0].mxu1 }
 0x150   :  { %v3111_v36 = vpop.f32.mrb[1].mxu1 }
 0x155   :  { %v328_v37 = vpop.f32.mrb[2].mxu1 }
 0x156   :  { %v329_v38 = vadd.f32 %v328_v37, %v178_v35  ;;  %v3116_v39 = vpop.f32.mrb[3].mxu1 }
 0x159   :  { %v489_v40 = vpop.f32.mrb[4].mxu1 }
 0x15a   :  { %v495_v41 = vadd.f32 %v489_v40, %v329_v38  ;;  %v3121_v42 = vpop.f32.mrb[5].mxu1 }
 0x15d   :  { %v653_v43 = vpop.f32.mrb[6].mxu1 }
 0x15e   :  { %v659_v44 = vadd.f32 %v653_v43, %v495_v41  ;;  %v3126_v45 = vpop.f32.mrb[7].mxu1 }
 0x161   :  { %v817_v46 = vpop.f32.mrb[8].mxu1 }
 0x162   :  { %v823_v47 = vadd.f32 %v817_v46, %v659_v44  ;;  %v3131_v48 = vpop.f32.mrb[9].mxu1 }
 0x165   :  { %v981_v49 = vpop.f32.mrb[10].mxu1 }
 0x166   :  { %v987_v50 = vadd.f32 %v981_v49, %v823_v47  ;;  %v3136_v1 = vpop.f32.mrb[11].mxu1 }
 0x16c   :  { %v1145_v52 = vpop.f32.mrb[12].mxu1 }
 0x16d   :  { %v1151_v53 = vadd.f32 %v1145_v52, %v987_v50  ;;  %v3141_v51 = vpop.f32.mrb[13].mxu1 }
 0x170   :  { %v1309_v54 = vpop.f32.mrb[14].mxu1 }
 0x171   :  { %v1315_v55 = vadd.f32 %v1309_v54, %v1151_v53  ;;  %v3146_v56 = vpop.f32.mrb[15].mxu1 }
 0x177   :  { %v1473_v57 = vpop.f32.mrb[16].mxu1 }
 0x178   :  { %v1479_v58 = vadd.f32 %v1473_v57, %v1315_v55  ;;  %v3151_v59 = vpop.f32.mrb[17].mxu1 }
 0x17a   :  { %v1487_v61 = vadd.f32 %v1483_v60, %v1479_v58 }
 0x17b   :  { %v1657_v62 = vpop.f32.mrb[18].mxu1 }
 0x17c   :  { %v1490_v63 = vmax.f32 %v1487_v61, 0.0  ;;  %v3156_v0 = vpop.f32.mrb[19].mxu1 }
 0x17e   :  { %1494 = vst.msk [vmem:[%s3703_s2 + $0x10] sm:$0xff] %vm1493_vm11, %v1490_v63 }
 0x17f   :  { %v1807_v2 = vpop.f32.mrb[20].mxu1 }
 0x180   :  { %v1808_v3 = vadd.f32 %v1807_v2, %v1657_v62  ;;  %v3161_v5 = vpop.f32.mrb[21].mxu1 }
 0x184   :  { %v1966_v7 = vpop.f32.mrb[22].mxu1 }
 0x185   :  { %v1972_v8 = vadd.f32 %v1966_v7, %v1808_v3  ;;  %v3166_v9 = vpop.f32.mrb[23].mxu1 }
 0x188   :  { %v2128_v10 = vpop.f32.mrb[24].mxu1 }
 0x189   :  { %v2134_v11 = vadd.f32 %v2128_v10, %v1972_v8  ;;  %v3171_v13 = vpop.f32.mrb[25].mxu1 }
 0x18f   :  { %v2290_v14 = vpop.f32.mrb[26].mxu1 }
 0x190   :  { %v2296_v15 = vadd.f32 %v2290_v14, %v2134_v11  ;;  %v3176_v16 = vpop.f32.mrb[27].mxu1 }
 0x191   :  { %v1402_v6 = vpop.f32.mrb[0].mxu0 }
 0x192   :  { %v1485_v17 = vadd.f32 %v1483_v60, %v1402_v6  ;;  %v1404_v19 = vpop.f32.mrb[1].mxu0 }
 0x193   :  { %v1486_v20 = vadd.f32 %v1483_v60, %v1404_v19  ;;  %v2452_v12 = vpop.f32.mrb[28].mxu1 }
 0x194   :  { %v1488_v4 = vmax.f32 %v1485_v17, 0.0  ;;  %v2458_v21 = vadd.f32 %v2452_v12, %v2296_v15  ;;  %v3181_v22 = vpop.f32.mrb[29].mxu1 }
 0x195   :  { %v1489_v18 = vmax.f32 %v1486_v20, 0.0 }
 0x196   :  { %1491 = vst [vmem:[%s3703_s2] sm:$0xff] %v1488_v4 }
 0x197   :  { %1492 = vst [vmem:[%s3703_s2 + $0x8] sm:$0xff] %v1489_v18 }
 0x19b   :  { %v2614_v23 = vpop.f32.mrb[30].mxu1 }
 0x19c   :  { %v2620_v24 = vadd.f32 %v2614_v23, %v2458_v21  ;;  %v3186_v26 = vpop.f32.mrb[31].mxu1 }
 0x19f   :  { %v2776_v25 = vpop.f32.mrb[32].mxu1 }
 0x1a0   :  { %v2782_v27 = vadd.f32 %v2776_v25, %v2620_v24  ;;  %v3191_v28 = vpop.f32.mrb[33].mxu1 }
 0x1a8   :  { %v2938_v29 = vpop.f32.mrb[34].mxu1 }
 0x1a9   :  { %v2944_v30 = vadd.f32 %v2938_v29, %v2782_v27  ;;  %v3196_v31 = vpop.f32.mrb[35].mxu1 }
 0x1ab   :  { %v2947_v32 = vadd.f32 %v2944_v30, %v1483_v60 }
 0x1ad   :  { %v2950_v33 = vmax.f32 %v2947_v32, 0.0 }
 0x1af   :  { %3070 = vst.msk [vmem:[%s3703_s2 + $0x28] sm:$0xff] %vm1493_vm11, %v2950_v33 }
 0x1d5   :  { %v2867_v34 = vpop.f32.mrb[2].mxu0 }
 0x1d6   :  { %v2945_v35 = vadd.f32 %v2867_v34, %v1483_v60  ;;  %v2869_v36 = vpop.f32.mrb[3].mxu0 }
 0x1d7   :  { %v2946_v37 = vadd.f32 %v2869_v36, %v1483_v60 }
 0x1d8   :  { %v2948_v38 = vmax.f32 %v2945_v35, 0.0 }
 0x1d9   :  { %v2949_v39 = vmax.f32 %v2946_v37, 0.0 }
 0x1da   :  { %3068 = vst [vmem:[%s3703_s2 + $0x18] sm:$0xff] %v2948_v38 }
 0x1db   :  { %3069 = vst [vmem:[%s3703_s2 + $0x20] sm:$0xff] %v2949_v39 }

</bundles_post_ra>
